<compile_context>
chip_gen: v5e
topology: v5e:2x2
jax: 0.10.0
libtpu: 0.0.40
codegen_flags: <defaults>
</compile_context>

<pallas_src>
import jax
import jax.numpy as jnp
from jax import lax
from jax.experimental import pallas as pl
from jax.experimental.pallas import tpu as pltpu


def _round_up(a: int, b: int) -> int:
    return (a + b - 1) // b * b


def _cond_linear_kernel(x_ref, w_ref, b_ref, emb_ref, y_ref, o_ref, acc_ref):
    k = pl.program_id(2)

    @pl.when(k == 0)
    def _init():
        acc_ref[...] = jnp.zeros_like(acc_ref)

    # MXU: x (tm, tk) contracted with w (tn, tk) on the last axis (trans_b);
    # no transpose in the wrapper or the kernel.
    acc_ref[...] += lax.dot_general(
        x_ref[...], w_ref[...],
        dimension_numbers=(((1,), (1,)), ((), ())),
        preferred_element_type=jnp.float32,
    )

    @pl.when(k == pl.num_programs(2) - 1)
    def _finalize():
        # Fused embedding lookup: one_hot(y) @ embed_tile, entirely on-chip.
        tm = acc_ref.shape[0]
        n_steps_pad = emb_ref.shape[0]
        steps = lax.broadcasted_iota(jnp.int32, (tm, n_steps_pad), 1)
        onehot = (y_ref[...] == steps).astype(jnp.float32)        # (tm, n_steps_pad)
        gamma = jnp.dot(onehot, emb_ref[...],
                        preferred_element_type=jnp.float32)       # (tm, tn)
        out = gamma * (acc_ref[...] + b_ref[...])                 # bias + scale once
        o_ref[...] = out.astype(o_ref.dtype)


def conditional_linear(x, weight, bias, embed_weight, y):
    """x: (B, num_in) f32; weight: (num_out, num_in); bias: (num_out,);
    embed_weight: (n_steps, num_out); y: (B,) int32."""
    B, num_in = x.shape
    num_out, _ = weight.shape
    n_steps = embed_weight.shape[0]

    # Tile sizes: lane-dense (128-multiple) N/K tiles, sublane-aligned M tile.
    tm = min(128, _round_up(B, 8))
    tn = min(256, _round_up(num_out, 128))
    tk = min(256, _round_up(num_in, 128))

    Bp = _round_up(B, tm)
    Np = _round_up(num_out, tn)
    Kp = _round_up(num_in, tk)
    Sp = _round_up(n_steps, 8)          # pad table rows (never selected by one-hot)

    # Zero-padding is exact: padded K columns contribute 0 to the matmul, padded
    # N columns / B rows are sliced off, padded table rows are never gathered.
    xp = jnp.pad(x, ((0, Bp - B), (0, Kp - num_in)))
    wp = jnp.pad(weight, ((0, Np - num_out), (0, Kp - num_in)))
    bp = jnp.pad(bias, (0, Np - num_out)).reshape(1, Np)
    ep = jnp.pad(embed_weight, ((0, Sp - n_steps), (0, Np - num_out)))
    yp = jnp.pad(y.astype(jnp.int32), (0, Bp - B)).reshape(Bp, 1)

    grid = (Bp // tm, Np // tn, Kp // tk)

    flops = 2 * Bp * Kp * Np + 2 * Bp * Sp * Np
    bytes_accessed = 4 * (Bp * Kp + Np * Kp + Np + Sp * Np + Bp + Bp * Np)

    out_p = pl.pallas_call(
        _cond_linear_kernel,
        out_shape=jax.ShapeDtypeStruct((Bp, Np), x.dtype),
        grid_spec=pltpu.PrefetchScalarGridSpec(
            num_scalar_prefetch=0,
            grid=grid,
            in_specs=[
                pl.BlockSpec((tm, tk), lambda i, j, k: (i, k)),       # x
                pl.BlockSpec((tn, tk), lambda i, j, k: (j, k)),       # weight (out, in)
                pl.BlockSpec((1, tn), lambda i, j, k: (0, j)),        # bias
                pl.BlockSpec((Sp, tn), lambda i, j, k: (0, j)),       # embed table
                pl.BlockSpec((tm, 1), lambda i, j, k: (i, 0)),        # y indices
            ],
            out_specs=pl.BlockSpec((tm, tn), lambda i, j, k: (i, j)),
            scratch_shapes=[pltpu.VMEM((tm, tn), jnp.float32)],
        ),
        compiler_params=pltpu.CompilerParams(
            dimension_semantics=("parallel", "parallel", "arbitrary"),
            vmem_limit_bytes=32 * 1024 * 1024,
        ),
        cost_estimate=pl.CostEstimate(
            flops=flops, transcendentals=0, bytes_accessed=bytes_accessed),
    )(xp, wp, bp, ep, yp)

    return out_p[:B, :num_out]


def _ref_forward(x, weight, bias, embed_weight, y):
    # Pure-JAX reference matching the PyTorch module.
    out = jnp.dot(x, weight.T, precision=lax.Precision.HIGHEST) + bias
    gamma = embed_weight[y]
    return gamma * out


if __name__ == "__main__":
    # Small shapes consistent with the module's forward; num_in/num_out chosen
    # to exercise the K reduction loop, N tiling, and the pad/slice path.
    B, num_in, num_out, n_steps = 64, 512, 384, 10

    key = jax.random.PRNGKey(0)
    k_x, k_w, k_b, k_e, k_y = jax.random.split(key, 5)

    # Deterministic parameter init (shapes as in __init__):
    #   lin.weight: (num_out, num_in), lin.bias: (num_out,)
    #   embed.weight: (n_steps, num_out), uniform_() -> U[0, 1)
    bound = 1.0 / jnp.sqrt(num_in)
    weight = jax.random.uniform(k_w, (num_out, num_in), jnp.float32, -bound, bound)
    bias = jax.random.uniform(k_b, (num_out,), jnp.float32, -bound, bound)
    embed_weight = jax.random.uniform(k_e, (n_steps, num_out), jnp.float32, 0.0, 1.0)

    x = jax.random.normal(k_x, (B, num_in), jnp.float32)
    y = jax.random.randint(k_y, (B,), 0, n_steps, jnp.int32)

    out = conditional_linear(x, weight, bias, embed_weight, y)
    out = jax.block_until_ready(out)

    ref = _ref_forward(x, weight, bias, embed_weight, y)
    assert out.shape == (B, num_out)
    assert jnp.allclose(out, ref, atol=2e-4, rtol=2e-4), "mismatch vs reference"

    print("KERNEL_OK")
</pallas_src>

<mosaic_0001>
module attributes {stable_mosaic.version = 11 : i64} {
  func.func @_cond_linear_kernel(%arg0: i32, %arg1: i32, %arg2: i32, %arg3: memref<64x256xf32, #tpu.memory_space<vmem>>, %arg4: memref<256x256xf32, #tpu.memory_space<vmem>>, %arg5: memref<1x256xf32, #tpu.memory_space<vmem>>, %arg6: memref<16x256xf32, #tpu.memory_space<vmem>>, %arg7: memref<64x1xi32, #tpu.memory_space<vmem>>, %arg8: memref<64x256xf32, #tpu.memory_space<vmem>>, %arg9: memref<64x256xf32, #tpu.memory_space<vmem>>) attributes {dimension_semantics = [#tpu.dimension_semantics<parallel>, #tpu.dimension_semantics<parallel>, #tpu.dimension_semantics<arbitrary>], iteration_bounds = array<i64: 1, 2, 2>, scalar_prefetch = 0 : i64, scratch_operands = 1 : i64, tpu.core_type = #tpu.core_type<tc>, window_params = [{transform_indices = @transform_0, window_bounds = array<i64: 64, 256>}, {transform_indices = @transform_1, window_bounds = array<i64: 256, 256>}, {transform_indices = @transform_2, window_bounds = array<i64: 1, 256>}, {transform_indices = @transform_3, window_bounds = array<i64: 16, 256>}, {transform_indices = @transform_4, window_bounds = array<i64: 64, 1>}, {transform_indices = @transform_5, window_bounds = array<i64: 64, 256>}]} {
    %c0_i32 = arith.constant 0 : i32
    %0 = arith.cmpi eq, %arg2, %c0_i32 : i32
    %1 = arith.extui %0 : i1 to i32
    %c0_i32_0 = arith.constant 0 : i32
    %2 = arith.cmpi ne, %1, %c0_i32_0 : i32
    scf.if %2 {
      %cst_9 = arith.constant 0.000000e+00 : f32
      %12 = vector.broadcast %cst_9 : f32 to vector<64x256xf32>
      %c0_10 = arith.constant 0 : index
      %c0_11 = arith.constant 0 : index
      %13 = vector.load %arg9[%c0_10, %c0_11] : memref<64x256xf32, #tpu.memory_space<vmem>>, vector<64x256xf32>
      tpu.vector_store %arg9[%c0_10, %c0_11], %12 {strides = array<i32>} : memref<64x256xf32, #tpu.memory_space<vmem>>, vector<64x256xf32>,
    } else {
    }
    %c0 = arith.constant 0 : index
    %c0_1 = arith.constant 0 : index
    %3 = vector.load %arg9[%c0, %c0_1] : memref<64x256xf32, #tpu.memory_space<vmem>>, vector<64x256xf32>
    %c0_2 = arith.constant 0 : index
    %c0_3 = arith.constant 0 : index
    %4 = vector.load %arg3[%c0_2, %c0_3] : memref<64x256xf32, #tpu.memory_space<vmem>>, vector<64x256xf32>
    %c0_4 = arith.constant 0 : index
    %c0_5 = arith.constant 0 : index
    %5 = vector.load %arg4[%c0_4, %c0_5] : memref<256x256xf32, #tpu.memory_space<vmem>>, vector<256x256xf32>
    %cst = arith.constant dense<0.000000e+00> : vector<64x256xf32>
    %6 = tpu.matmul %4, %5, %cst {dimension_numbers = #tpu.dot_dimension_numbers<[1], [1], [0], [0], [0, 0, 1, 0], [], []>} : vector<64x256xf32>, vector<256x256xf32>, vector<64x256xf32> -> vector<64x256xf32>
    %7 = arith.addf %3, %6 : vector<64x256xf32>
    %c0_6 = arith.constant 0 : index
    %c0_7 = arith.constant 0 : index
    %8 = vector.load %arg9[%c0_6, %c0_7] : memref<64x256xf32, #tpu.memory_space<vmem>>, vector<64x256xf32>
    tpu.vector_store %arg9[%c0_6, %c0_7], %7 {strides = array<i32>} : memref<64x256xf32, #tpu.memory_space<vmem>>, vector<64x256xf32>,
    %c1_i32 = arith.constant 1 : i32
    %9 = arith.cmpi eq, %arg2, %c1_i32 : i32
    %10 = arith.extui %9 : i1 to i32
    %c0_i32_8 = arith.constant 0 : i32
    %11 = arith.cmpi ne, %10, %c0_i32_8 : i32
    scf.if %11 {
      %12 = tpu.iota {dimensions = array<i32: 1>} : vector<64x16xi32>
      %c0_9 = arith.constant 0 : index
      %c0_10 = arith.constant 0 : index
      %13 = vector.load %arg7[%c0_9, %c0_10] : memref<64x1xi32, #tpu.memory_space<vmem>>, vector<64x1xi32>
      %14 = vector.broadcast %13 : vector<64x1xi32> to vector<64x16xi32>
      %15 = arith.cmpi eq, %14, %12 : vector<64x16xi32>
      %16 = arith.extui %15 : vector<64x16xi1> to vector<64x16xi32>
      %17 = arith.sitofp %16 : vector<64x16xi32> to vector<64x16xf32>
      %c0_11 = arith.constant 0 : index
      %c0_12 = arith.constant 0 : index
      %18 = vector.load %arg6[%c0_11, %c0_12] : memref<16x256xf32, #tpu.memory_space<vmem>>, vector<16x256xf32>
      %cst_13 = arith.constant dense<0.000000e+00> : vector<64x256xf32>
      %19 = tpu.matmul %17, %18, %cst_13 {dimension_numbers = #tpu.dot_dimension_numbers<[1], [0], [0], [1], [0, 0, 1, 1], [], []>} : vector<64x16xf32>, vector<16x256xf32>, vector<64x256xf32> -> vector<64x256xf32>
      %c0_14 = arith.constant 0 : index
      %c0_15 = arith.constant 0 : index
      %20 = vector.load %arg9[%c0_14, %c0_15] : memref<64x256xf32, #tpu.memory_space<vmem>>, vector<64x256xf32>
      %c0_16 = arith.constant 0 : index
      %c0_17 = arith.constant 0 : index
      %21 = vector.load %arg5[%c0_16, %c0_17] : memref<1x256xf32, #tpu.memory_space<vmem>>, vector<1x256xf32>
      %22 = vector.broadcast %21 : vector<1x256xf32> to vector<64x256xf32>
      %23 = arith.addf %20, %22 : vector<64x256xf32>
      %24 = arith.mulf %19, %23 : vector<64x256xf32>
      %c0_18 = arith.constant 0 : index
      %c0_19 = arith.constant 0 : index
      %25 = vector.load %arg8[%c0_18, %c0_19] : memref<64x256xf32, #tpu.memory_space<vmem>>, vector<64x256xf32>
      tpu.vector_store %arg8[%c0_18, %c0_19], %24 {strides = array<i32>} : memref<64x256xf32, #tpu.memory_space<vmem>>, vector<64x256xf32>,
    } else {
    }
    return
  }
  func.func @transform_0(%arg0: i32, %arg1: i32, %arg2: i32) -> (i32, i32) {
    %c0_i32 = arith.constant 0 : i32
    return %arg0, %arg2 : i32, i32
  }
  func.func @transform_1(%arg0: i32, %arg1: i32, %arg2: i32) -> (i32, i32) {
    %c0_i32 = arith.constant 0 : i32
    return %arg1, %arg2 : i32, i32
  }
  func.func @transform_2(%arg0: i32, %arg1: i32, %arg2: i32) -> (i32, i32) {
    %c0_i32 = arith.constant 0 : i32
    %c0_i32_0 = arith.constant 0 : i32
    return %c0_i32, %arg1 : i32, i32
  }
  func.func @transform_3(%arg0: i32, %arg1: i32, %arg2: i32) -> (i32, i32) {
    %c0_i32 = arith.constant 0 : i32
    %c0_i32_0 = arith.constant 0 : i32
    return %c0_i32, %arg1 : i32, i32
  }
  func.func @transform_4(%arg0: i32, %arg1: i32, %arg2: i32) -> (i32, i32) {
    %c0_i32 = arith.constant 0 : i32
    %c0_i32_0 = arith.constant 0 : i32
    return %arg0, %c0_i32 : i32, i32
  }
  func.func @transform_5(%arg0: i32, %arg1: i32, %arg2: i32) -> (i32, i32) {
    %c0_i32 = arith.constant 0 : i32
    return %arg0, %arg1 : i32, i32
  }
}

</mosaic_0001>

<bundles_post_ra>
// kernel: tpu_custom_call.1
= control target key start
LH: loop header
LB: loop body
LE: loop exit
PB: predicated region body
PF: predicated region fallthrough
CT: control target
= control target key end

     0   :  { %s2104_s0 = inlined_call_operand.hbm [shape: f32[64,512], index: 0, kind: input, shape index: {}]   ;;  %s2105_s1 = inlined_call_operand.hbm [shape: f32[512,512], index: 1, kind: input, shape index: {}]   ;;  %s2106_s2 = inlined_call_operand.hbm [shape: f32[1,512], index: 2, kind: input, shape index: {}]   ;;  %s2107_s3 = inlined_call_operand.vmem [shape: f32[16,512], index: 3, kind: input, shape index: {}]   ;;  %s2108_s4 = inlined_call_operand.vmem [shape: s32[64,1], index: 4, kind: input, shape index: {}]   ;;  %s2109_s5 = inlined_call_operand.hbm [shape: f32[64,512], index: 5, kind: output, shape index: {}]  }
   0x1   :  { %2130 = sst [smem:[#allocation34_spill]] %s2105_s1 }
   0x2   :  { %2131 = sst [smem:[#allocation35_spill]] %s2108_s4 }
   0x3   :  { %2132 = sst [smem:[#allocation36_spill]] %s2109_s5 }
   0x4   :  { %10 = vsyncpa [#allocation4], 0 }
   0x5   :  { %12 = vsyncpa [#allocation4 + $0x1], 0 }
   0x6   :  { %13 = vsyncpa [#allocation7], 0 }
   0x7   :  { %15 = vsyncpa [#allocation7 + $0x1], 0 }
   0x8   :  { %16 = vsyncpa [#allocation5], 0 }
   0x9   :  { %18 = vsyncpa [#allocation5 + $0x1], 0  ;;  %s1655_s18 = smov 0   ;;  %s1657_s19 = smov 0  }
   0xa   :  { %s1659_s20 = smov 0   ;;  %s1661_s21 = smov 0  }
   0xb   :  { %s1663_s22 = smov 0   ;;  %s1665_s23 = smov 0  }
   0xc   :  { %s1667_s24 = smov 0   ;;  %s1669_s25 = smov 0  }
   0xd   :  { %s1671_s26 = smov 0   ;;  %s1673_s27 = smov 0  }
   0xe   :  { %s1675_s28 = smov 0   ;;  %s1677_s29 = smov 0  }
   0xf   :  { %s1679_s30 = smov 0   ;;  %s1681_s6 = smov 0  }
  0x10 LB: > { %2133 = sst [smem:[#allocation15_spill]] %s1562_s18  ;;  %s1724_s7 = sadd.s32 4294967295, %s1614_s6   ;;  %s1614_s6 = sphi %s1681_s6, %s24_s6   ;;  %s1610_s30 = sphi %s1679_s30, %s2195_s30   ;;  %s1606_s29 = sphi %s1677_s29, %s2194_s29   ;;  %s1602_s28 = sphi %s1675_s28, %s2193_s28   ;;  %s1598_s27 = sphi %s1673_s27, %s2185_s27   ;;  %s1594_s26 = sphi %s1671_s26, %s2192_s26   ;;  %s1590_s25 = sphi %s1669_s25, %s2191_s25   ;;  %s1586_s24 = sphi %s1667_s24, %s2190_s24   ;;  %s1582_s23 = sphi %s1665_s23, %s2182_s23   ;;  %s1578_s22 = sphi %s1663_s22, %s2181_s22   ;;  %s1574_s21 = sphi %s1661_s21, %s2180_s21   ;;  %s1570_s20 = sphi %s1659_s20, %s2189_s20   ;;  %s1566_s19 = sphi %s1657_s19, %s2188_s19   ;;  %s1562_s18 = sphi %s1655_s18, %s2178_s18  }
  0x11   : > { %2134 = sst [smem:[#allocation16_spill]] %s1566_s19  ;;  %s36_s9 = sadd.s32 1, %s1606_s29 }
  0x12   : > { %2135 = sst [smem:[#allocation17_spill]] %s1578_s22  ;;  %s39_s10 = sadd.s32 1, %s1610_s30 }
  0x13   : > { %2136 = sst [smem:[#allocation18_spill]] %s1582_s23  ;;  %p37_p0 = scmp.ge.s32.totalorder %s36_s9, 2 }
  0x14   : > { %2137 = sst [smem:[#allocation19_spill]] %s1594_s26  ;;  %s52_s11 = sadd.s32 1, %s1594_s26 }
  0x15   : > { %2138 = sst [smem:[#allocation20_spill]] %s1598_s27  ;;  %p59_p1 = scmp.ne.s32.totalorder %s1594_s26, %s1590_s25 }
  0x16   : > { %2139 = sst [smem:[#allocation21_spill]] %s1602_s28  ;;  %p60_p2 = scmp.eq.s32.totalorder %s1614_s6, 0 }
  0x17   : > { %2140 = sst [smem:[#allocation22_spill]] %s1606_s29  ;;  %s2197_s9 = smov (%p37_p0, %s36_s9), 0 }
  0x18   : > { %2141 = sst [smem:[#allocation23_spill]] %s1724_s7  ;;  %s2199_s10 = smov (!%p37_p0, %s39_s10), %s1610_s30 }
  0x19   : > { %2142 = sst [smem:[#allocation24_spill]] %s2197_s9  ;;  %s48_s12 = ssub.s32 %s1606_s29, %s2197_s9 }
  0x1a   : > { %p1740_p3 = por %p60_p2, %p59_p1  ;;  %p41_p4 = scmp.ge.s32.totalorder %s2199_s10, 2 }
  0x1b   : > { %p50_p5 = scmp.eq.s32.totalorder %s48_s12, 0  ;;  %p65_p6 = scmp.ne.s32.totalorder %s1590_s25, %s1586_s24 }
  0x1c   : > { %p66_p7 = scmp.eq.s32.totalorder %s1724_s7, 0  ;;  %s2201_s10 = smov (%p41_p4, %s2199_s10), 0 }
  0x1d   : > { %2144 = sst [smem:[#allocation25_spill]] %s2201_s10  ;;  %s75_s16 = ssub.s32 %s1610_s30, %s2201_s10 }
  0x1e   : > { %s1749_s14 = scalar_select %p50_p5, %s1594_s26, %s52_s11  }
  0x1f   : > { %p1753_p8 = por %p66_p7, %p65_p6  ;;  %s77_s17 = sor.u32 %s75_s16, %s48_s12 }
  0x20   : > { %2145 = sst [smem:[#allocation26_spill]] %s1749_s14  ;;  %s80_s24 = sadd.s32 1, %s1582_s23 }
  0x21   : > { %s2146_s15 = scalar_select %p1753_p8, 1, 0 }
  0x22   : > { %p78_p9 = scmp.eq.s32.totalorder %s77_s17, 0  ;;  %p87_p10 = scmp.ne.s32.totalorder %s1582_s23, %s1578_s22 }
  0x23   : > { %2147 = sst [smem:[#allocation27_spill]] %s2146_s15  ;;  %p93_p11 = scmp.ne.s32.totalorder %s1578_s22, %s1574_s21 }
  0x24   : > { %p104_p12 = scmp.eq.s32.totalorder %s75_s16, 0  ;;  %p1769_p13 = por %p87_p10, %p60_p2 }
  0x25   : > { %s1765_s8 = scalar_select %p78_p9, %s1582_s23, %s80_s24  }
  0x26   : > { %p1775_p0 = por %p93_p11, %p66_p7  ;;  %s106_s10 = sadd.s32 1, %s1570_s20 }
  0x27   : > { %2148 = sst [smem:[#allocation28_spill]] %s1765_s8  ;;  %p113_p1 = scmp.ne.s32.totalorder %s1570_s20, %s1566_s19 }
  0x28   : > { %s2150_s9 = scalar_select %p1775_p0, 1, 0 }
  0x29   : > { %s1783_s12 = scalar_select %p104_p12, %s1570_s20, %s106_s10  }
  0x2a   : > { %2151 = sst [smem:[#allocation29_spill]] %s2150_s9  ;;  %p1787_p4 = por %p113_p1, %p60_p2 }
  0x2b   : > { %2152 = sst [smem:[#allocation30_spill]] %s1783_s12  ;;  %p119_p5 = scmp.ne.s32.totalorder %s1566_s19, %s1562_s18 }
  0x2c   : > { %p197_p6 = scmp.eq.s32.totalorder %s1724_s7, 3  ;;  %s2154_s16 = sadd.s32 4294967294, %s1614_s6  }
  0x2d   : > { %p203_p9 = scmp.eq.s32.totalorder %s2154_s16, 3  ;;  %p1798_p10 = por %p119_p5, %p66_p7 }
  0x2e   : > { %p1802_p11 = por %p197_p6, %p113_p1  ;;  %p1180_p2 = scmp.ge.s32.totalorder %s1614_s6, 4 }
  0x2f   : > { %s2155_s17 = scalar_select %p1798_p10, 1, 0 }
  0x30   : > { %s2157_s24 = scalar_select %p1802_p11, 1, 0 }
  0x31   : > { %2156 = sst [smem:[#allocation31_spill]] %s2155_s17  ;;  %p1806_p12 = por %p203_p9, %p119_p5 }
  0x32   : > { %2158 = sst [smem:[#allocation32_spill]] %s2157_s24  ;;  %228 = sbr.rel (%p1180_p2) target bundleno = 79 (0x4f), region = 20 }
  0x33   : > { %s2159_s10 = scalar_select %p1806_p12, 1, 0 }
  0x34   : > { %s257_s16 = sand.u32 (!%p1180_p2), 1, %s1614_s6   ;;  %s259_s14 = sand.u32 (!%p1180_p2), 1, %s1582_s23  }
  0x35   : > { %2160 = sst [smem:[#allocation33_spill]] %s2159_s10  ;;  %s1184_s8 = sshll.u32 (!%p1180_p2), %s259_s14, 9 }
  0x36   : > { %s1186_s12 = sshll.u32 (!%p1180_p2), %s1606_s29, 1  ;;  %s1232_s18 = sshll.u32 (!%p1180_p2), %s1610_s30, 7 }
  0x37   : > { %s267_s5 = sadd.s32 %s1232_s18, %s1186_s12  ;;  %s261_s24 = scalar_lea.vmem [#allocation6], %s1184_s8 }
  0x38   : > { %s272_s28 = sshll.u32 %s261_s24, 4  ;;  %s1188_s4 = sshll.u32 %s267_s5, 3  ;;  %s273_s28 = int_to_ptr.vmem [resolvable:$true] %s272_s28 }
  0x39   : > { %s2161_s1 = sld [smem:[#allocation34_spill]]  ;;  %s232_s19 = sand.u32 1, %s1594_s26  }
  0x3a   : > { %s1181_s23 = sshll.u32 %s232_s19, 7  ;;  %s258_s14 = scalar_lea.sflag [#allocation7], %s257_s16 }
  0x3b   : > { %s1616_s22 = smov 512   ;;  %s1617_s7 = smov 256  }
  0x3c   : > { %s1618_s15 = smov 16   ;;  %s1231_s18 = sshll.u32 %s1606_s29, 4 }
  0x3d   : > { %s244_s12 = scalar_lea.hbm %s2104_s0, %s1231_s18  ;;  %s236_s27 = scalar_lea.vmem [#allocation3], %s1181_s23 }
  0x3e   : > { %s245_s24 = sshll.u32 %s244_s12, 4  ;;  %s233_s10 = scalar_lea.sflag [#allocation4], %s232_s19  ;;  %s246_s24 = int_to_ptr.hbm [resolvable:$true] %s245_s24 }
  0x3f   : > { %s269_s17 = scalar_lea.hbm %s2161_s1, %s1188_s4  ;;  %s247_s4 = sshll.u32 %s236_s27, 4  ;;  %s248_s4 = int_to_ptr.vmem [resolvable:$true] %s247_s4 }
  0x40   : > { %s270_s9 = sshll.u32 %s269_s17, 4  ;;  %s284_s17 = sand.u32 1, %s1570_s20   ;;  %s271_s9 = int_to_ptr.hbm [resolvable:$true] %s270_s9 }
  0x41   : > { %1240 = dma.hbm_to_vmem [thread:$0]  (%p1769_p13), %s271_s9, 8192, %s273_s28, %s258_s14, %s1616_s22, %s1617_s7, %s1618_s15  }
  0x42   : > { %1239 = dma.hbm_to_vmem [thread:$0]  (%p1740_p3), %s246_s24, 2048, %s248_s4, %s233_s10, %s1616_s22, %s1617_s7, %s1618_s15  }
  0x43   : > { %s1189_s16 = sshll.u32 %s284_s17, 1  ;;  %s1190_s1 = sshll.u32 %s1610_s30, 1 }
  0x44   : > { %s290_s28 = scalar_lea.hbm %s2106_s2, %s1190_s1  ;;  %s286_s29 = scalar_lea.vmem [#allocation8], %s1189_s16 }
  0x45   : > { %s292_s9 = sshll.u32 %s290_s28, 4  ;;  %s294_s5 = sshll.u32 %s286_s29, 4  ;;  %s293_s9 = int_to_ptr.hbm [resolvable:$true] %s292_s9  ;;  %s295_s5 = int_to_ptr.vmem [resolvable:$true] %s294_s5 }
  0x46   : > { %1241 = dma.hbm_to_vmem [thread:$0]  (%p1787_p4), %s293_s9, 32, %s295_s5, %s258_s14  }
  0x47   : > { %300 = sbr.rel (!%p1787_p4) target bundleno = 79 (0x4f), region = 36  ;;  %s1191_s23 = sshll.u32 (%p1787_p4), %s284_s17, 5 }
  0x48   : > { %s1233_s19 = sshll.u32 (%p1787_p4), %s1610_s30, 4  ;;  %s304_s1 = scalar_lea.vmem (%p1787_p4), [#allocation9], %s1191_s23 }
  0x49   : > { %s307_s13 = scalar_lea.vmem (%p1787_p4), %s2107_s3, %s1233_s19 }
  0x4a   : > { %v320_v0 = vld [vmem:[%s307_s13] sm:$0xff] (%p1787_p4)  ;;  %v322_v1 = vld [vmem:[%s307_s13 + $0x8] sm:$0xff] (%p1787_p4) }
  0x4b   : > { %v324_v2 = vld [vmem:[%s307_s13 + $0x20] sm:$0xff] (%p1787_p4)  ;;  %321 = vst [vmem:[%s304_s1] sm:$0xff] (%p1787_p4), %v320_v0  ;;  %v326_v3 = vld [vmem:[%s307_s13 + $0x28] sm:$0xff] (%p1787_p4) }
  0x4c   : > { %323 = vst [vmem:[%s304_s1 + $0x8] sm:$0xff] %v322_v1 }
  0x4d   : > { %325 = vst [vmem:[%s304_s1 + $0x10] sm:$0xff] %v324_v2 }
  0x4e   : > { %327 = vst [vmem:[%s304_s1 + $0x18] sm:$0xff] %v326_v3 }
  0x4f PF: > { %p1194_p3 = scmp.ge.s32.totalorder %s1614_s6, 1  ;;  %p332_p7 = scmp.lt.s32.totalorder %s1614_s6, 5 }
  0x51   : > { %p333_p13 = pnand %p1194_p3, %p332_p7 }
  0x52   : > { %s338_s29 = sand.u32 (!%p333_p13), 1, %s1590_s25  }
  0x53   : > { %336 = sbr.rel (%p333_p13) target bundleno = 703 (0x2bf), region = 59  ;;  %s1195_s15 = sshll.u32 (!%p333_p13), %s338_s29, 7 }
  0x54   : > { %s339_s21 = scalar_lea.sflag (!%p333_p13), [#allocation4], %s338_s29  ;;  %s1843_s14 = scalar_lea.vmem (!%p333_p13), [#allocation3], %s1195_s15 }
  0x58   : > { %1545 = dma.done.wait (%p1753_p8), %s339_s21, 2048  }
  0x59   : > { %1547 = vsyncadd (%p1753_p8), %s339_s21, 4294965248  ;;  %s2163_s18 = sld [smem:[#allocation23_spill]] }
  0x5a   : > { %s2164_s8 = sld [smem:[#allocation17_spill]] }
  0x5f   : > { %s348_s27 = sand.u32 1, %s2163_s18  }
  0x60   : > { %s350_s4 = sand.u32 1, %s2164_s8   ;;  %s349_s17 = scalar_lea.sflag [#allocation7], %s348_s27 }
  0x61   : > { %s1196_s24 = sshll.u32 %s350_s4, 9 }
  0x62   : > { %s1851_s10 = scalar_lea.vmem [#allocation6], %s1196_s24 }
  0x63   : > { %1549 = dma.done.wait (%p1775_p0), %s349_s17, 8192  }
  0x64   : > { %1551 = vsyncadd (%p1775_p0), %s349_s17, 4294959104  ;;  %s2166_s16 = sld [smem:[#allocation16_spill]] }
  0x6a   : > { %s1858_s28 = sand.u32 1, %s2166_s16  }
  0x6b   : > { %s1197_s9 = sshll.u32 %s1858_s28, 1 }
  0x6c   : > { %s1861_s5 = scalar_lea.vmem [#allocation8], %s1197_s9 }
  0x6d   : > { %1553 = dma.done.wait (%p1798_p10), %s349_s17, 32  }
  0x6e   : > { %1555 = vsyncadd (%p1798_p10), %s349_s17, 4294967264  ;;  %s1198_s23 = sshll.u32 %s1858_s28, 5  ;;  %s1199_s19 = sshll.u32 %s1858_s28, 7 }
  0x6f   : > { %s1869_s22 = scalar_lea.vmem [#allocation9], %s1198_s23  ;;  %s1871_s7 = scalar_lea.vmem [#allocation10], %s1199_s19 }
  0x70   : > { %s2168_s13 = sld [smem:[#allocation20_spill]] }
  0x76   : > { %p1200_p8 = scmp.ne.s32.totalorder %s2168_s13, 0 }
  0x78   : > { %433 = sbr.rel (%p1200_p8) target bundleno = 142 (0x8e), region = 79 }
  0x7d   : > { %v1619_v4 = vmov 0.0  }
  0x7e   : > { %434 = vst [vmem:[#allocation2 + $0x30] sm:$0xff] %v1619_v4 }
  0x7f   : > { %435 = vst [vmem:[#allocation2] sm:$0xff] %v1619_v4 }
  0x80   : > { %436 = vst [vmem:[#allocation2 + $0x58] sm:$0xff] %v1619_v4 }
  0x81   : > { %437 = vst [vmem:[#allocation2 + $0x18] sm:$0xff] %v1619_v4 }
  0x82   : > { %438 = vst [vmem:[#allocation2 + $0x50] sm:$0xff] %v1619_v4 }
  0x83   : > { %439 = vst [vmem:[#allocation2 + $0x68] sm:$0xff] %v1619_v4 }
  0x84   : > { %440 = vst [vmem:[#allocation2 + $0x8] sm:$0xff] %v1619_v4 }
  0x85   : > { %441 = vst [vmem:[#allocation2 + $0x48] sm:$0xff] %v1619_v4 }
  0x86   : > { %442 = vst [vmem:[#allocation2 + $0x40] sm:$0xff] %v1619_v4 }
  0x87   : > { %443 = vst [vmem:[#allocation2 + $0x20] sm:$0xff] %v1619_v4 }
  0x88   : > { %444 = vst [vmem:[#allocation2 + $0x10] sm:$0xff] %v1619_v4 }
  0x89   : > { %445 = vst [vmem:[#allocation2 + $0x38] sm:$0xff] %v1619_v4 }
  0x8a   : > { %446 = vst [vmem:[#allocation2 + $0x60] sm:$0xff] %v1619_v4 }
  0x8b   : > { %447 = vst [vmem:[#allocation2 + $0x70] sm:$0xff] %v1619_v4 }
  0x8c   : > { %448 = vst [vmem:[#allocation2 + $0x78] sm:$0xff] %v1619_v4 }
  0x8d   : > { %449 = vst [vmem:[#allocation2 + $0x28] sm:$0xff] %v1619_v4 }
  0x8e PF: > { %v544_v5 = vld [vmem:[%s1851_s10 + $0x1f0] sm:$0xff]  ;;  %v545_v6 = vld [vmem:[%s1851_s10 + $0x1f8] sm:$0xff]  ;;  %v542_v9 = vld [vmem:[%s1851_s10 + $0x1e0] sm:$0xff]  ;;  %s2169_s1 = sld [smem:[#allocation20_spill]] }
  0x8f   : > { %628 = vmatpush.xpose.msra.mxu2 %v544_v5  ;;  %669 = vmatpush.xpose.msra.mxu3 %v545_v6  ;;  %v512_v7 = vld [vmem:[%s1851_s10 + $0xf0] sm:$0xff]  ;;  %v513_v8 = vld [vmem:[%s1851_s10 + $0xf8] sm:$0xff]  ;;  %v543_v10 = vld [vmem:[%s1851_s10 + $0x1e8] sm:$0xff] }
  0x90   : > { %546 = vmatpush.xpose.msra.mxu0 %v512_v7  ;;  %587 = vmatpush.xpose.msra.mxu1 %v513_v8  ;;  %v510_v11 = vld [vmem:[%s1851_s10 + $0xe0] sm:$0xff]  ;;  %v511_v12 = vld [vmem:[%s1851_s10 + $0xe8] sm:$0xff]  ;;  %v540_v13 = vld [vmem:[%s1851_s10 + $0x1d0] sm:$0xff] }
  0x91   : > { %v541_v14 = vld [vmem:[%s1851_s10 + $0x1d8] sm:$0xff]  ;;  %v508_v15 = vld [vmem:[%s1851_s10 + $0xd0] sm:$0xff]  ;;  %v538_v17 = vld [vmem:[%s1851_s10 + $0x1c0] sm:$0xff] }
  0x92   : > { %v509_v16 = vld [vmem:[%s1851_s10 + $0xd8] sm:$0xff]  ;;  %v539_v18 = vld [vmem:[%s1851_s10 + $0x1c8] sm:$0xff]  ;;  %v506_v19 = vld [vmem:[%s1851_s10 + $0xc0] sm:$0xff] }
  0x93   : > { %629 = vmatpush.xpose.msra.mxu2 %v542_v9  ;;  %670 = vmatpush.xpose.msra.mxu3 %v543_v10  ;;  %v507_v20 = vld [vmem:[%s1851_s10 + $0xc8] sm:$0xff]  ;;  %v536_v21 = vld [vmem:[%s1851_s10 + $0x1b0] sm:$0xff]  ;;  %v537_v22 = vld [vmem:[%s1851_s10 + $0x1b8] sm:$0xff] }
  0x94   : > { %547 = vmatpush.xpose.msra.mxu0 %v510_v11  ;;  %588 = vmatpush.xpose.msra.mxu1 %v511_v12  ;;  %v504_v23 = vld [vmem:[%s1851_s10 + $0xb0] sm:$0xff]  ;;  %v505_v24 = vld [vmem:[%s1851_s10 + $0xb8] sm:$0xff]  ;;  %v534_v25 = vld [vmem:[%s1851_s10 + $0x1a0] sm:$0xff]  ;;  %p1201_p0 = scmp.ne.s32.totalorder %s2169_s1, 1 }
  0x95   : > { %v535_v26 = vld [vmem:[%s1851_s10 + $0x1a8] sm:$0xff]  ;;  %v502_v27 = vld [vmem:[%s1851_s10 + $0xa0] sm:$0xff]  ;;  %v532_v29 = vld [vmem:[%s1851_s10 + $0x190] sm:$0xff]  ;;  %s2170_s15 = sld [smem:[#allocation35_spill]] (!%p1201_p0) }
  0x96   : > { %v503_v28 = vld [vmem:[%s1851_s10 + $0xa8] sm:$0xff]  ;;  %v533_v30 = vld [vmem:[%s1851_s10 + $0x198] sm:$0xff]  ;;  %v500_v31 = vld [vmem:[%s1851_s10 + $0x90] sm:$0xff] }
  0x97   : > { %630 = vmatpush.xpose.msra.mxu2 %v540_v13  ;;  %671 = vmatpush.xpose.msra.mxu3 %v541_v14  ;;  %v501_v32 = vld [vmem:[%s1851_s10 + $0x98] sm:$0xff]  ;;  %v530_v33 = vld [vmem:[%s1851_s10 + $0x180] sm:$0xff]  ;;  %v531_v34 = vld [vmem:[%s1851_s10 + $0x188] sm:$0xff] }
  0x98   : > { %548 = vmatpush.xpose.msra.mxu0 %v508_v15  ;;  %589 = vmatpush.xpose.msra.mxu1 %v509_v16  ;;  %v498_v35 = vld [vmem:[%s1851_s10 + $0x80] sm:$0xff]  ;;  %v499_v36 = vld [vmem:[%s1851_s10 + $0x88] sm:$0xff]  ;;  %v528_v37 = vld [vmem:[%s1851_s10 + $0x170] sm:$0xff] }
  0x99   : > { %v529_v38 = vld [vmem:[%s1851_s10 + $0x178] sm:$0xff]  ;;  %v496_v39 = vld [vmem:[%s1851_s10 + $0x70] sm:$0xff]  ;;  %v526_v41 = vld [vmem:[%s1851_s10 + $0x160] sm:$0xff] }
  0x9a   : > { %v497_v40 = vld [vmem:[%s1851_s10 + $0x78] sm:$0xff]  ;;  %v527_v42 = vld [vmem:[%s1851_s10 + $0x168] sm:$0xff]  ;;  %v494_v43 = vld [vmem:[%s1851_s10 + $0x60] sm:$0xff] }
  0x9b   : > { %631 = vmatpush.xpose.msra.mxu2 %v538_v17  ;;  %672 = vmatpush.xpose.msra.mxu3 %v539_v18  ;;  %v495_v44 = vld [vmem:[%s1851_s10 + $0x68] sm:$0xff]  ;;  %v524_v45 = vld [vmem:[%s1851_s10 + $0x150] sm:$0xff]  ;;  %v525_v46 = vld [vmem:[%s1851_s10 + $0x158] sm:$0xff] }
  0x9c   : > { %549 = vmatpush.xpose.msra.mxu0 %v506_v19  ;;  %590 = vmatpush.xpose.msra.mxu1 %v507_v20  ;;  %v492_v47 = vld [vmem:[%s1851_s10 + $0x50] sm:$0xff]  ;;  %v493_v48 = vld [vmem:[%s1851_s10 + $0x58] sm:$0xff]  ;;  %v522_v49 = vld [vmem:[%s1851_s10 + $0x140] sm:$0xff] }
  0x9d   : > { %v523_v50 = vld [vmem:[%s1851_s10 + $0x148] sm:$0xff]  ;;  %v490_v51 = vld [vmem:[%s1851_s10 + $0x40] sm:$0xff]  ;;  %v520_v53 = vld [vmem:[%s1851_s10 + $0x130] sm:$0xff] }
  0x9e   : > { %v491_v52 = vld [vmem:[%s1851_s10 + $0x48] sm:$0xff]  ;;  %v521_v54 = vld [vmem:[%s1851_s10 + $0x138] sm:$0xff]  ;;  %v488_v55 = vld [vmem:[%s1851_s10 + $0x30] sm:$0xff] }
  0x9f   : > { %632 = vmatpush.xpose.msra.mxu2 %v536_v21  ;;  %673 = vmatpush.xpose.msra.mxu3 %v537_v22  ;;  %v489_v56 = vld [vmem:[%s1851_s10 + $0x38] sm:$0xff]  ;;  %v518_v57 = vld [vmem:[%s1851_s10 + $0x120] sm:$0xff]  ;;  %v519_v58 = vld [vmem:[%s1851_s10 + $0x128] sm:$0xff] }
  0xa0   : > { %550 = vmatpush.xpose.msra.mxu0 %v504_v23  ;;  %591 = vmatpush.xpose.msra.mxu1 %v505_v24  ;;  %v486_v59 = vld [vmem:[%s1851_s10 + $0x20] sm:$0xff]  ;;  %v487_v60 = vld [vmem:[%s1851_s10 + $0x28] sm:$0xff]  ;;  %v516_v61 = vld [vmem:[%s1851_s10 + $0x110] sm:$0xff] }
  0xa1   : > { %v517_v62 = vld [vmem:[%s1851_s10 + $0x118] sm:$0xff]  ;;  %v484_v63 = vld [vmem:[%s1851_s10 + $0x10] sm:$0xff]  ;;  %v514_v1 = vld [vmem:[%s1851_s10 + $0x100] sm:$0xff] }
  0xa2   : > { %v485_v0 = vld [vmem:[%s1851_s10 + $0x18] sm:$0xff]  ;;  %v515_v2 = vld [vmem:[%s1851_s10 + $0x108] sm:$0xff]  ;;  %v482_v3 = vld [vmem:[%s1851_s10] sm:$0xff] }
  0xa3   : > { %633 = vmatpush.xpose.msra.mxu2 %v534_v25  ;;  %674 = vmatpush.xpose.msra.mxu3 %v535_v26  ;;  %v483_v4 = vld [vmem:[%s1851_s10 + $0x8] sm:$0xff]  ;;  %v466_v5 = vld [vmem:[%s1843_s14] sm:$0xff]  ;;  %v468_v7 = vld [vmem:[%s1843_s14 + $0x10] sm:$0xff] }
  0xa4   : > { %551 = vmatpush.xpose.msra.mxu0 %v502_v27  ;;  %592 = vmatpush.xpose.msra.mxu1 %v503_v28  ;;  %v467_v6 = vld [vmem:[%s1843_s14 + $0x8] sm:$0xff]  ;;  %v469_v8 = vld [vmem:[%s1843_s14 + $0x18] sm:$0xff]  ;;  %v470_v9 = vld [vmem:[%s1843_s14 + $0x20] sm:$0xff] }
  0xa5   : > { %v471_v10 = vld [vmem:[%s1843_s14 + $0x28] sm:$0xff]  ;;  %v472_v11 = vld [vmem:[%s1843_s14 + $0x30] sm:$0xff]  ;;  %v473_v12 = vld [vmem:[%s1843_s14 + $0x38] sm:$0xff] }
  0xa6   : > { %v474_v13 = vld [vmem:[%s1843_s14 + $0x40] sm:$0xff]  ;;  %v475_v14 = vld [vmem:[%s1843_s14 + $0x48] sm:$0xff]  ;;  %v476_v15 = vld [vmem:[%s1843_s14 + $0x50] sm:$0xff] }
  0xa7   : > { %634 = vmatpush.xpose.msra.mxu2 %v532_v29  ;;  %675 = vmatpush.xpose.msra.mxu3 %v533_v30  ;;  %v477_v16 = vld [vmem:[%s1843_s14 + $0x58] sm:$0xff]  ;;  %v478_v17 = vld [vmem:[%s1843_s14 + $0x60] sm:$0xff]  ;;  %v479_v18 = vld [vmem:[%s1843_s14 + $0x68] sm:$0xff] }
  0xa8   : > { %552 = vmatpush.xpose.msra.mxu0 %v500_v31  ;;  %593 = vmatpush.xpose.msra.mxu1 %v501_v32  ;;  %v480_v19 = vld [vmem:[%s1843_s14 + $0x70] sm:$0xff]  ;;  %v481_v20 = vld [vmem:[%s1843_s14 + $0x78] sm:$0xff]  ;;  %v451_v27 = vld [vmem:[#allocation2] sm:$0xff] }
  0xa9   : > { %v450_v22 = vld [vmem:[#allocation2 + $0x30] sm:$0xff]  ;;  %v452_v32 = vld [vmem:[#allocation2 + $0x58] sm:$0xff] }
  0xab   : > { %635 = vmatpush.xpose.msra.mxu2 %v530_v33  ;;  %676 = vmatpush.xpose.msra.mxu3 %v531_v34 }
  0xac   : > { %553 = vmatpush.xpose.msra.mxu0 %v498_v35  ;;  %594 = vmatpush.xpose.msra.mxu1 %v499_v36 }
  0xaf   : > { %636 = vmatpush.xpose.msra.mxu2 %v528_v37  ;;  %677 = vmatpush.xpose.msra.mxu3 %v529_v38  ;;  %v453_v37 = vld [vmem:[#allocation2 + $0x18] sm:$0xff] }
  0xb0   : > { %554 = vmatpush.xpose.msra.mxu0 %v496_v39  ;;  %595 = vmatpush.xpose.msra.mxu1 %v497_v40 }
  0xb3   : > { %637 = vmatpush.xpose.msra.mxu2 %v526_v41  ;;  %678 = vmatpush.xpose.msra.mxu3 %v527_v42  ;;  %v454_v42 = vld [vmem:[#allocation2 + $0x50] sm:$0xff] }
  0xb4   : > { %555 = vmatpush.xpose.msra.mxu0 %v494_v43  ;;  %596 = vmatpush.xpose.msra.mxu1 %v495_v44 }
  0xb7   : > { %638 = vmatpush.xpose.msra.mxu2 %v524_v45  ;;  %679 = vmatpush.xpose.msra.mxu3 %v525_v46 }
  0xb8   : > { %556 = vmatpush.xpose.msra.mxu0 %v492_v47  ;;  %597 = vmatpush.xpose.msra.mxu1 %v493_v48  ;;  %v455_v47 = vld [vmem:[#allocation2 + $0x68] sm:$0xff] }
  0xbb   : > { %639 = vmatpush.xpose.msra.mxu2 %v522_v49  ;;  %680 = vmatpush.xpose.msra.mxu3 %v523_v50 }
  0xbc   : > { %557 = vmatpush.xpose.msra.mxu0 %v490_v51  ;;  %598 = vmatpush.xpose.msra.mxu1 %v491_v52  ;;  %v456_v52 = vld [vmem:[#allocation2 + $0x8] sm:$0xff] }
  0xbf   : > { %640 = vmatpush.xpose.msra.mxu2 %v520_v53  ;;  %681 = vmatpush.xpose.msra.mxu3 %v521_v54 }
  0xc0   : > { %558 = vmatpush.xpose.msra.mxu0 %v488_v55  ;;  %599 = vmatpush.xpose.msra.mxu1 %v489_v56 }
  0xc3   : > { %641 = vmatpush.xpose.msra.mxu2 %v518_v57  ;;  %682 = vmatpush.xpose.msra.mxu3 %v519_v58  ;;  %v457_v57 = vld [vmem:[#allocation2 + $0x48] sm:$0xff] }
  0xc4   : > { %559 = vmatpush.xpose.msra.mxu0 %v486_v59  ;;  %600 = vmatpush.xpose.msra.mxu1 %v487_v60 }
  0xc7   : > { %642 = vmatpush.xpose.msra.mxu2 %v516_v61  ;;  %683 = vmatpush.xpose.msra.mxu3 %v517_v62  ;;  %v458_v62 = vld [vmem:[#allocation2 + $0x40] sm:$0xff] }
  0xc8   : > { %560 = vmatpush.xpose.msra.mxu0 %v484_v63  ;;  %601 = vmatpush.xpose.msra.mxu1 %v485_v0 }
  0xcb   : > { %643 = vmatpush.xpose.msra.mxu2 %v514_v1  ;;  %684 = vmatpush.xpose.msra.mxu3 %v515_v2 }
  0xcc   : > { %561 = vmatpush.xpose.msra.mxu0 %v482_v3  ;;  %602 = vmatpush.xpose.msra.mxu1 %v483_v4  ;;  %v459_v3 = vld [vmem:[#allocation2 + $0x20] sm:$0xff] }
  0xce   : > { %644 = vmatmul.f32.vlgmr.msra.gmra.mxu2 %v466_v5  ;;  %685 = vmatmul.f32.vlgmr.msra.gmra.mxu3 %v467_v6 }
  0xcf   : > { %562 = vmatmul.f32.vlgmr.msra.gmra.mxu0 %v466_v5  ;;  %603 = vmatmul.f32.vlgmr.msra.gmra.mxu1 %v467_v6 }
  0xd6   : > { %647 = vmatmul.f32.gmra.mxu2 %v468_v7  ;;  %688 = vmatmul.f32.gmra.mxu3 %v469_v8 }
  0xd7   : > { %565 = vmatmul.f32.gmra.mxu0 %v468_v7  ;;  %606 = vmatmul.f32.gmra.mxu1 %v469_v8  ;;  %v460_v8 = vld [vmem:[#allocation2 + $0x10] sm:$0xff] }
  0xde   : > { %650 = vmatmul.f32.gmra.mxu2 %v470_v9  ;;  %691 = vmatmul.f32.gmra.mxu3 %v471_v10 }
  0xdf   : > { %568 = vmatmul.f32.gmra.mxu0 %v470_v9  ;;  %609 = vmatmul.f32.gmra.mxu1 %v471_v10 }
  0xe6   : > { %653 = vmatmul.f32.gmra.mxu2 %v472_v11  ;;  %694 = vmatmul.f32.gmra.mxu3 %v473_v12 }
  0xe7   : > { %571 = vmatmul.f32.gmra.mxu0 %v472_v11  ;;  %612 = vmatmul.f32.gmra.mxu1 %v473_v12 }
  0xee   : > { %656 = vmatmul.f32.gmra.mxu2 %v474_v13  ;;  %697 = vmatmul.f32.gmra.mxu3 %v475_v14 }
  0xef   : > { %574 = vmatmul.f32.gmra.mxu0 %v474_v13  ;;  %615 = vmatmul.f32.gmra.mxu1 %v475_v14  ;;  %v461_v13 = vld [vmem:[#allocation2 + $0x38] sm:$0xff] }
  0xf6   : > { %659 = vmatmul.f32.gmra.mxu2 %v476_v15  ;;  %700 = vmatmul.f32.gmra.mxu3 %v477_v16 }
  0xf7   : > { %577 = vmatmul.f32.gmra.mxu0 %v476_v15  ;;  %618 = vmatmul.f32.gmra.mxu1 %v477_v16 }
  0xfe   : > { %662 = vmatmul.f32.gmra.mxu2 %v478_v17  ;;  %703 = vmatmul.f32.gmra.mxu3 %v479_v18 }
  0xff   : > { %580 = vmatmul.f32.gmra.mxu0 %v478_v17  ;;  %621 = vmatmul.f32.gmra.mxu1 %v479_v18  ;;  %v462_v18 = vld [vmem:[#allocation2 + $0x60] sm:$0xff] }
 0x106   : > { %665 = vmatmul.f32.gmra.mxu2 %v480_v19  ;;  %706 = vmatmul.f32.gmra.mxu3 %v481_v20 }
 0x107   : > { %583 = vmatmul.f32.gmra.mxu0 %v480_v19  ;;  %624 = vmatmul.f32.gmra.mxu1 %v481_v20 }
 0x14c   : > { %v563_v21 = vpop.f32.mrf.mxu0  ;;  %v604_v23 = vpop.f32.mrf.mxu1 }
 0x14d   : > { %v605_v24 = vadd.f32 %v604_v23, %v563_v21  ;;  %v463_v23 = vld [vmem:[#allocation2 + $0x70] sm:$0xff] }
 0x14f   : > { %v710_v25 = vadd.f32 %v605_v24, %v450_v22 }
 0x151   : > { %726 = vst [vmem:[#allocation2 + $0x30] sm:$0xff] %v710_v25  ;;  %v645_v26 = vpop.f32.mrf.mxu2  ;;  %v686_v28 = vpop.f32.mrf.mxu3 }
 0x152   : > { %v687_v29 = vadd.f32 %v686_v28, %v645_v26  ;;  %v464_v28 = vld [vmem:[#allocation2 + $0x78] sm:$0xff] }
 0x154   : > { %v711_v30 = vadd.f32 %v687_v29, %v451_v27  ;;  %v566_v31 = vpop.f32.mrf.mxu0  ;;  %v607_v33 = vpop.f32.mrf.mxu1 }
 0x155   : > { %v608_v34 = vadd.f32 %v607_v33, %v566_v31  ;;  %v465_v33 = vld [vmem:[#allocation2 + $0x28] sm:$0xff] }
 0x156   : > { %727 = vst [vmem:[#allocation2] sm:$0xff] %v711_v30 }
 0x157   : > { %v712_v35 = vadd.f32 %v608_v34, %v452_v32 }
 0x159   : > { %728 = vst [vmem:[#allocation2 + $0x58] sm:$0xff] %v712_v35  ;;  %v648_v36 = vpop.f32.mrf.mxu2  ;;  %v689_v38 = vpop.f32.mrf.mxu3 }
 0x15a   : > { %v690_v39 = vadd.f32 %v689_v38, %v648_v36 }
 0x15c   : > { %v713_v40 = vadd.f32 %v690_v39, %v453_v37  ;;  %v569_v41 = vpop.f32.mrf.mxu0  ;;  %v610_v43 = vpop.f32.mrf.mxu1 }
 0x15d   : > { %v611_v44 = vadd.f32 %v610_v43, %v569_v41 }
 0x15e   : > { %729 = vst [vmem:[#allocation2 + $0x18] sm:$0xff] %v713_v40 }
 0x15f   : > { %v714_v45 = vadd.f32 %v611_v44, %v454_v42 }
 0x161   : > { %730 = vst [vmem:[#allocation2 + $0x50] sm:$0xff] %v714_v45  ;;  %v651_v46 = vpop.f32.mrf.mxu2  ;;  %v692_v48 = vpop.f32.mrf.mxu3 }
 0x162   : > { %v693_v49 = vadd.f32 %v692_v48, %v651_v46 }
 0x164   : > { %v715_v50 = vadd.f32 %v693_v49, %v455_v47  ;;  %v572_v51 = vpop.f32.mrf.mxu0  ;;  %v613_v53 = vpop.f32.mrf.mxu1 }
 0x165   : > { %v614_v54 = vadd.f32 %v613_v53, %v572_v51 }
 0x166   : > { %731 = vst [vmem:[#allocation2 + $0x68] sm:$0xff] %v715_v50 }
 0x167   : > { %v716_v55 = vadd.f32 %v614_v54, %v456_v52 }
 0x169   : > { %732 = vst [vmem:[#allocation2 + $0x8] sm:$0xff] %v716_v55  ;;  %v654_v56 = vpop.f32.mrf.mxu2  ;;  %v695_v58 = vpop.f32.mrf.mxu3 }
 0x16a   : > { %v696_v59 = vadd.f32 %v695_v58, %v654_v56 }
 0x16c   : > { %v717_v60 = vadd.f32 %v696_v59, %v457_v57  ;;  %v575_v61 = vpop.f32.mrf.mxu0  ;;  %v616_v63 = vpop.f32.mrf.mxu1 }
 0x16d   : > { %v617_v0 = vadd.f32 %v616_v63, %v575_v61 }
 0x16e   : > { %733 = vst [vmem:[#allocation2 + $0x48] sm:$0xff] %v717_v60 }
 0x16f   : > { %v718_v1 = vadd.f32 %v617_v0, %v458_v62 }
 0x171   : > { %734 = vst [vmem:[#allocation2 + $0x40] sm:$0xff] %v718_v1  ;;  %v657_v2 = vpop.f32.mrf.mxu2  ;;  %v698_v4 = vpop.f32.mrf.mxu3 }
 0x172   : > { %v699_v5 = vadd.f32 %v698_v4, %v657_v2 }
 0x174   : > { %v719_v6 = vadd.f32 %v699_v5, %v459_v3  ;;  %v578_v7 = vpop.f32.mrf.mxu0  ;;  %v619_v9 = vpop.f32.mrf.mxu1 }
 0x175   : > { %v620_v10 = vadd.f32 %v619_v9, %v578_v7 }
 0x176   : > { %735 = vst [vmem:[#allocation2 + $0x20] sm:$0xff] %v719_v6 }
 0x177   : > { %v720_v11 = vadd.f32 %v620_v10, %v460_v8 }
 0x179   : > { %736 = vst [vmem:[#allocation2 + $0x10] sm:$0xff] %v720_v11  ;;  %v660_v12 = vpop.f32.mrf.mxu2  ;;  %v701_v14 = vpop.f32.mrf.mxu3 }
 0x17a   : > { %v702_v15 = vadd.f32 %v701_v14, %v660_v12 }
 0x17c   : > { %v721_v16 = vadd.f32 %v702_v15, %v461_v13  ;;  %v581_v17 = vpop.f32.mrf.mxu0  ;;  %v622_v19 = vpop.f32.mrf.mxu1 }
 0x17d   : > { %v623_v20 = vadd.f32 %v622_v19, %v581_v17 }
 0x17e   : > { %737 = vst [vmem:[#allocation2 + $0x38] sm:$0xff] %v721_v16 }
 0x17f   : > { %v722_v21 = vadd.f32 %v623_v20, %v462_v18 }
 0x181   : > { %738 = vst [vmem:[#allocation2 + $0x60] sm:$0xff] %v722_v21  ;;  %v663_v22 = vpop.f32.mrf.mxu2  ;;  %v704_v24 = vpop.f32.mrf.mxu3 }
 0x182   : > { %v705_v25 = vadd.f32 %v704_v24, %v663_v22 }
 0x184   : > { %v723_v26 = vadd.f32 %v705_v25, %v463_v23  ;;  %v584_v27 = vpop.f32.mrf.mxu0  ;;  %v625_v29 = vpop.f32.mrf.mxu1 }
 0x185   : > { %v626_v30 = vadd.f32 %v625_v29, %v584_v27 }
 0x186   : > { %739 = vst [vmem:[#allocation2 + $0x70] sm:$0xff] %v723_v26 }
 0x187   : > { %v724_v31 = vadd.f32 %v626_v30, %v464_v28 }
 0x189   : > { %740 = vst [vmem:[#allocation2 + $0x78] sm:$0xff] %v724_v31  ;;  %v666_v32 = vpop.f32.mrf.mxu2  ;;  %v707_v34 = vpop.f32.mrf.mxu3 }
 0x18a   : > { %v708_v35 = vadd.f32 %v707_v34, %v666_v32  ;;  %745 = sbr.rel (%p1201_p0) target bundleno = 680 (0x2a8), region = 83 }
 0x18c   : > { %v725_v36 = vadd.f32 %v708_v35, %v465_v33 }
 0x18e   : > { %741 = vst [vmem:[#allocation2 + $0x28] sm:$0xff] %v725_v36 }
 0x18f   : > { %v753_v37 = vld [vmem:[%s2170_s15 + $0x28] sm:$0xff]  ;;  %v752_v38 = vld [vmem:[%s2170_s15 + $0x20] sm:$0xff]  ;;  %v1620_v39 = vmov 0   ;;  %v754_v40 = vld [vmem:[%s2170_s15 + $0x30] sm:$0xff]  ;;  %v746_v50 = vlaneseq  ;;  %vm808_vm0 = vcmask 130048   ;;  %v1621_v54 = vmov 0.0  }
 0x190   : > { %1374 = vset.pattern.permute.xlu1 %v1620_v39  ;;  %1373 = vset.pattern.permute.xlu0 %v1620_v39  ;;  %v806_v41 = vld [vmem:[%s1869_s22 + $0x10] sm:$0xff]  ;;  %v807_v42 = vld [vmem:[%s1869_s22 + $0x18] sm:$0xff]  ;;  %v749_v43 = vld [vmem:[%s2170_s15 + $0x8] sm:$0xff] }
 0x191   : > { %772 = vperm.xlu1 %1374, %v753_v37   ;;  %769 = vperm.xlu0 %1373, %v752_v38   ;;  %v748_v44 = vld [vmem:[%s2170_s15] sm:$0xff]  ;;  %v750_v45 = vld [vmem:[%s2170_s15 + $0x10] sm:$0xff]  ;;  %v751_v46 = vld [vmem:[%s2170_s15 + $0x18] sm:$0xff]  ;;  %v747_v51 = vand.u32 127, %v746_v50 }
 0x192   : > { %1375 = vset.pattern.permute.xlu2 %v1620_v39  ;;  %1235 = vmatpush.msra.mxu2 %v806_v41  ;;  %v755_v47 = vld [vmem:[%s2170_s15 + $0x38] sm:$0xff]  ;;  %v804_v48 = vld [vmem:[%s1869_s22] sm:$0xff]  ;;  %v805_v49 = vld [vmem:[%s1869_s22 + $0x8] sm:$0xff] }
 0x193   : > { %775 = vperm.xlu2 %1375, %v754_v40   ;;  %1237 = vmatpush.msra.mxu3 %v807_v42  ;;  %v931_v5 = vld [vmem:[%s1861_s5] sm:$0x3]  ;;  %v915_v10 = vld [vmem:[#allocation2 + $0x30] sm:$0xff]  ;;  %v926_v24 = vld [vmem:[#allocation2 + $0x38] sm:$0xff] }
 0x194   : > { %847 = vmatpush.msra.mxu0 %v806_v41  ;;  %888 = vmatpush.msra.mxu1 %v807_v42  ;;  %v2000_v6 = vperm.slane %v931_v5, 0  ;;  %v2002_v7 = vperm.slane %v931_v5, 1  ;;  %v923_v8 = vld [vmem:[#allocation2 + $0x40] sm:$0xff]  ;;  %v925_v21 = vld [vmem:[#allocation2 + $0x10] sm:$0xff]  ;;  %v917_v26 = vld [vmem:[#allocation2 + $0x58] sm:$0xff] }
 0x195   : > { %1236 = vmatpush.msra.mxu2 %v804_v48  ;;  %1238 = vmatpush.msra.mxu3 %v805_v49  ;;  %v924_v9 = vld [vmem:[#allocation2 + $0x20] sm:$0xff]  ;;  %v918_v28 = vld [vmem:[#allocation2 + $0x18] sm:$0xff]  ;;  %v928_v40 = vld [vmem:[#allocation2 + $0x70] sm:$0xff] }
 0x196   : > { %848 = vmatpush.msra.mxu0 %v804_v48  ;;  %889 = vmatpush.msra.mxu1 %v805_v49  ;;  %v945_v11 = vadd.f32 %v2000_v6, %v923_v8  ;;  %v946_v12 = vadd.f32 %v2002_v7, %v924_v9  ;;  %v916_v13 = vld [vmem:[#allocation2] sm:$0xff]  ;;  %v937_v14 = vadd.f32 %v2000_v6, %v915_v10  ;;  %v919_v42 = vld [vmem:[#allocation2 + $0x50] sm:$0xff] }
 0x197   : > { %v938_v17 = vadd.f32 %v2002_v7, %v916_v13  ;;  %v947_v27 = vadd.f32 %v2000_v6, %v925_v21  ;;  %v948_v29 = vadd.f32 %v2002_v7, %v926_v24  ;;  %v939_v30 = vadd.f32 %v2000_v6, %v917_v26  ;;  %v927_v37 = vld [vmem:[#allocation2 + $0x60] sm:$0xff] }
 0x198   : > { %v940_v32 = vadd.f32 %v2002_v7, %v918_v28 }
 0x199   : > { %760 = vperm.xlu1 %1374, %v749_v43   ;;  %757 = vperm.xlu0 %1373, %v748_v44   ;;  %v949_v43 = vadd.f32 %v2000_v6, %v927_v37  ;;  %v920_v44 = vld [vmem:[#allocation2 + $0x68] sm:$0xff] }
 0x19a   : > { %v942_v48 = vadd.f32 %v2002_v7, %v920_v44 }
 0x19b   : > { %763 = vperm.xlu2 %1375, %v750_v45   ;;  %v950_v45 = vadd.f32 %v2002_v7, %v928_v40 }
 0x1a1   : > { %766 = vperm.xlu1 %1374, %v751_v46   ;;  %778 = vperm.xlu0 %1373, %v755_v47   ;;  %v941_v46 = vadd.f32 %v2000_v6, %v919_v42 }
 0x1ed   : > { %v776_v58 = vpop.permute.xlu2 %775 }
 0x1ee   : > { %vm786_vm4 = vcmp.eq.s32.totalorder %v776_v58, %v747_v51  ;;  %v921_v58 = vld [vmem:[#allocation2 + $0x8] sm:$0xff] }
 0x1ef   : > { %v1208_v61 = vsel %vm786_vm4, 1.0, %v1621_v54 }
 0x1f5   : > { %v764_v63 = vpop.permute.xlu2 %763 }
 0x1f6   : > { %vm782_vm6 = vcmp.eq.s32.totalorder %v764_v63, %v747_v51 }
 0x1f7   : > { %v1204_v1 = vsel %vm782_vm6, 1.0, %v1621_v54 }
 0x203   : > { %v770_v52 = vpop.permute.xlu0 %769  ;;  %v773_v53 = vpop.permute.xlu1 %772 }
 0x204   : > { %vm784_vm1 = vcmp.eq.s32.totalorder %v770_v52, %v747_v51  ;;  %vm785_vm2 = vcmp.eq.s32.totalorder %v773_v53, %v747_v51  ;;  %v929_v53 = vld [vmem:[#allocation2 + $0x78] sm:$0xff] }
 0x205   : > { %v1206_v55 = vsel %vm784_vm1, 1.0, %v1621_v54  ;;  %v1207_v56 = vsel %vm785_vm2, 1.0, %v1621_v54 }
 0x206   : > { %1214 = vmatmul.msk.f32.vlgmr.msra.gmra.mxu2 %vm808_vm0, %v1206_v55  ;;  %1222 = vmatmul.msk.f32.vlgmr.msra.gmra.mxu3 %vm808_vm0, %v1206_v55 }
 0x20b   : > { %v758_v57 = vpop.permute.xlu0 %757  ;;  %v761_v60 = vpop.permute.xlu1 %760 }
 0x20c   : > { %vm780_vm3 = vcmp.eq.s32.totalorder %v758_v57, %v747_v51  ;;  %vm781_vm5 = vcmp.eq.s32.totalorder %v761_v60, %v747_v51  ;;  %v922_v60 = vld [vmem:[#allocation2 + $0x48] sm:$0xff] }
 0x20d   : > { %v1202_v59 = vsel %vm780_vm3, 1.0, %v1621_v54  ;;  %v1203_v62 = vsel %vm781_vm5, 1.0, %v1621_v54 }
 0x20e   : > { %1210 = vmatmul.msk.f32.vlgmr.msra.gmra.mxu0 %vm808_vm0, %v1202_v59  ;;  %1215 = vmatmul.msk.f32.gmra.mxu2 %vm808_vm0, %v1207_v56 }
 0x20f   : > { %1218 = vmatmul.msk.f32.vlgmr.msra.gmra.mxu1 %vm808_vm0, %v1202_v59  ;;  %1223 = vmatmul.msk.f32.gmra.mxu3 %vm808_vm0, %v1207_v56  ;;  %v930_v56 = vld [vmem:[#allocation2 + $0x28] sm:$0xff]  ;;  %v951_v59 = vadd.f32 %v2000_v6, %v929_v53 }
 0x213   : > { %v779_v0 = vpop.permute.xlu0 %778  ;;  %v767_v3 = vpop.permute.xlu1 %766 }
 0x214   : > { %vm787_vm7 = vcmp.eq.s32.totalorder %v779_v0, %v747_v51  ;;  %vm783_vm8 = vcmp.eq.s32.totalorder %v767_v3, %v747_v51  ;;  %v944_v0 = vadd.f32 %v2002_v7, %v922_v60 }
 0x215   : > { %v1209_v2 = vsel %vm787_vm7, 1.0, %v1621_v54  ;;  %v1205_v4 = vsel %vm783_vm8, 1.0, %v1621_v54 }
 0x216   : > { %1211 = vmatmul.msk.f32.gmra.mxu0 %vm808_vm0, %v1203_v62  ;;  %1216 = vmatmul.msk.f32.gmra.mxu2 %vm808_vm0, %v1208_v61 }
 0x217   : > { %1219 = vmatmul.msk.f32.gmra.mxu1 %vm808_vm0, %v1203_v62  ;;  %1224 = vmatmul.msk.f32.gmra.mxu3 %vm808_vm0, %v1208_v61  ;;  %v952_v61 = vadd.f32 %v2002_v7, %v930_v56  ;;  %v943_v62 = vadd.f32 %v2000_v6, %v921_v58 }
 0x21e   : > { %1212 = vmatmul.msk.f32.gmra.mxu0 %vm808_vm0, %v1204_v1  ;;  %1217 = vmatmul.msk.f32.gmra.mxu2 %vm808_vm0, %v1209_v2 }
 0x21f   : > { %1220 = vmatmul.msk.f32.gmra.mxu1 %vm808_vm0, %v1204_v1  ;;  %1225 = vmatmul.msk.f32.gmra.mxu3 %vm808_vm0, %v1209_v2 }
 0x226   : > { %1213 = vmatmul.msk.f32.gmra.mxu0 %vm808_vm0, %v1205_v4 }
 0x227   : > { %1221 = vmatmul.msk.f32.gmra.mxu1 %vm808_vm0, %v1205_v4 }
 0x289   : > { %v862_v15 = vpop.f32.mrf.mxu2  ;;  %v903_v16 = vpop.f32.mrf.mxu3 }
 0x28a   : > { %v961_v18 = vmul.f32 %v945_v11, %v862_v15  ;;  %v962_v19 = vmul.f32 %v946_v12, %v903_v16 }
 0x28b   : > { %v850_v20 = vpop.f32.mrf.mxu0 }
 0x28c   : > { %977 = vst [vmem:[%s1871_s7 + $0x40] sm:$0xff] %v961_v18  ;;  %v953_v22 = vmul.f32 %v937_v14, %v850_v20  ;;  %v891_v23 = vpop.f32.mrf.mxu1 }
 0x28d   : > { %978 = vst [vmem:[%s1871_s7 + $0x48] sm:$0xff] %v962_v19  ;;  %v954_v25 = vmul.f32 %v938_v17, %v891_v23 }
 0x28e   : > { %969 = vst [vmem:[%s1871_s7] sm:$0xff] %v953_v22 }
 0x28f   : > { %970 = vst [vmem:[%s1871_s7 + $0x8] sm:$0xff] %v954_v25 }
 0x291   : > { %v865_v31 = vpop.f32.mrf.mxu2 }
 0x292   : > { %v963_v33 = vmul.f32 %v947_v27, %v865_v31  ;;  %v906_v34 = vpop.f32.mrf.mxu3 }
 0x293   : > { %v964_v35 = vmul.f32 %v948_v29, %v906_v34  ;;  %v853_v36 = vpop.f32.mrf.mxu0 }
 0x294   : > { %979 = vst [vmem:[%s1871_s7 + $0x50] sm:$0xff] %v963_v33  ;;  %v955_v38 = vmul.f32 %v939_v30, %v853_v36  ;;  %v894_v39 = vpop.f32.mrf.mxu1 }
 0x295   : > { %980 = vst [vmem:[%s1871_s7 + $0x58] sm:$0xff] %v964_v35  ;;  %v956_v41 = vmul.f32 %v940_v32, %v894_v39 }
 0x296   : > { %971 = vst [vmem:[%s1871_s7 + $0x10] sm:$0xff] %v955_v38 }
 0x297   : > { %972 = vst [vmem:[%s1871_s7 + $0x18] sm:$0xff] %v956_v41 }
 0x299   : > { %v868_v47 = vpop.f32.mrf.mxu2 }
 0x29a   : > { %v965_v49 = vmul.f32 %v949_v43, %v868_v47  ;;  %v909_v50 = vpop.f32.mrf.mxu3 }
 0x29b   : > { %v966_v51 = vmul.f32 %v950_v45, %v909_v50  ;;  %v856_v52 = vpop.f32.mrf.mxu0 }
 0x29c   : > { %981 = vst [vmem:[%s1871_s7 + $0x60] sm:$0xff] %v965_v49  ;;  %v957_v54 = vmul.f32 %v941_v46, %v856_v52  ;;  %v897_v55 = vpop.f32.mrf.mxu1 }
 0x29d   : > { %982 = vst [vmem:[%s1871_s7 + $0x68] sm:$0xff] %v966_v51  ;;  %v958_v57 = vmul.f32 %v942_v48, %v897_v55 }
 0x29e   : > { %973 = vst [vmem:[%s1871_s7 + $0x20] sm:$0xff] %v957_v54 }
 0x29f   : > { %974 = vst [vmem:[%s1871_s7 + $0x28] sm:$0xff] %v958_v57 }
 0x2a1   : > { %v871_v63 = vpop.f32.mrf.mxu2 }
 0x2a2   : > { %v967_v1 = vmul.f32 %v951_v59, %v871_v63  ;;  %v912_v2 = vpop.f32.mrf.mxu3 }
 0x2a3   : > { %v968_v3 = vmul.f32 %v952_v61, %v912_v2  ;;  %v859_v4 = vpop.f32.mrf.mxu0 }
 0x2a4   : > { %983 = vst [vmem:[%s1871_s7 + $0x70] sm:$0xff] %v967_v1  ;;  %v959_v5 = vmul.f32 %v943_v62, %v859_v4  ;;  %v900_v8 = vpop.f32.mrf.mxu1 }
 0x2a5   : > { %984 = vst [vmem:[%s1871_s7 + $0x78] sm:$0xff] %v968_v3  ;;  %v960_v9 = vmul.f32 %v944_v0, %v900_v8 }
 0x2a6   : > { %975 = vst [vmem:[%s1871_s7 + $0x30] sm:$0xff] %v959_v5 }
 0x2a7   : > { %976 = vst [vmem:[%s1871_s7 + $0x38] sm:$0xff] %v960_v9 }
 0x2a8 PF: > { %s2171_s5 = sld [smem:[#allocation21_spill]]  ;;  %s1001_s21 = sshll.u32 %s1871_s7, 4  ;;  %s1002_s21 = int_to_ptr.vmem [resolvable:$true] %s1001_s21 }
 0x2a9   : > { %s2173_s26 = sld [smem:[#allocation36_spill]]  ;;  %s986_s8 = scalar_lea.sflag [#allocation5], %s1858_s28 }
 0x2ae   : > { %s1234_s22 = sshll.u32 %s2171_s5, 4 }
 0x2af   : > { %s2174_s14 = smov %s2173_s26  ;;  %s1000_s29 = scalar_lea.hbm %s2173_s26, %s1234_s22 }
 0x2b0   : > { %s1003_s18 = sshll.u32 %s1000_s29, 4  ;;  %s1480_s17 = scalar_lea.hbm %s2174_s14, 256  ;;  %s1004_s18 = int_to_ptr.hbm [resolvable:$true] %s1003_s18 }
 0x2b1   : > { %s1474_s12 = sshra.s32 %s1004_s18, 4  ;;  %s1475_s12 = int_to_ptr.hbm [resolvable:$true] %s1474_s12 }
 0x2b2   : > { %s1476_s27 = scalar_lea.hbm %s1475_s12, 128  ;;  %p1481_p6 = scmp.lt.s32.totalorder %s1475_s12, %s2174_s14 }
 0x2b3   : > { %p1477_p1 = scmp.ne.s32.totalorder %s1475_s12, %s1476_s27  ;;  %p1482_p9 = scmp.lt.s32.totalorder %s1480_s17, %s1476_s27 }
 0x2b5   : > { %p1478_p4 = pnand %p1477_p1, %p1802_p11  ;;  %p1483_p10 = por %p1482_p9, %p1481_p6 }
 0x2b7   : > { %p1479_p5 = pneg %p1478_p4 }
 0x2b9   : > { %p1484_p2 = pnand %p1483_p10, %p1479_p5 }
 0x2bb   : > { %1487 = shalt.err (!%p1484_p2)
}
 0x2bc   : > { %s1622_s28 = smov 256   ;;  %s1623_s7 = smov 512  }
 0x2bd   : > { %s1624_s11 = smov 16  }
 0x2be   : > { %1245 = dma.vmem_to_hbm [thread:$0]  (%p1802_p11), %s1002_s21, 2048, %s1004_s18, %s986_s8, %s1622_s28, %s1623_s7, %s1624_s11  }
 0x2bf PF: > { %s2175_s9 = sld [smem:[#allocation15_spill]]  ;;  %p1251_p3 = scmp.ge.s32.totalorder %s1614_s6, 2 }
 0x2c1   : > { %p1248_p7 = pnand %p1251_p3, %p1806_p12 }
 0x2c3   : > { %p1249_p13 = pneg %p1248_p7 }
 0x2c5   : > { %s1018_s5 = sand.u32 1, %s2175_s9  }
 0x2c6   : > { %s1019_s22 = scalar_lea.sflag [#allocation5], %s1018_s5 }
 0x2c7   : > { %1557 = dma.done.wait (%p1249_p13), %s1019_s22, 2048  }
 0x2c8   : > { %1559 = vsyncadd (%p1249_p13), %s1019_s22, 4294965248  ;;  %s24_s6 = sadd.s32 1, %s1614_s6   ;;  %s2178_s18 = sld [smem:[#allocation16_spill]] }
 0x2c9   : > { %p2057_p8 = scmp.ge.s32.totalorder %s24_s6, 6   ;;  %s2179_s1 = sld [smem:[#allocation30_spill]] }
 0x2ca   : > { %s2180_s21 = sld [smem:[#allocation17_spill]]  ;;  %s2188_s19 = smov %s1570_s20 }
 0x2cb   : > { %s2181_s22 = sld [smem:[#allocation18_spill]]  ;;  %s2190_s24 = smov %s1590_s25 }
 0x2cc   : > { %s2182_s23 = sld [smem:[#allocation28_spill]]  ;;  %s2193_s28 = smov %s1610_s30 }
 0x2cd   : > { %s2183_s26 = sld [smem:[#allocation19_spill]] }
 0x2ce   : > { %s2184_s29 = sld [smem:[#allocation26_spill]] }
 0x2cf   : > { %s2185_s27 = sld [smem:[#allocation22_spill]]  ;;  %s2189_s20 = smov %s2179_s1 }
 0x2d0   : > { %s2186_s8 = sld [smem:[#allocation24_spill]] }
 0x2d1   : > { %s2187_s12 = sld [smem:[#allocation25_spill]] }
 0x2d3   : > { %s2191_s25 = smov %s2183_s26  ;;  %23 = sbr.rel (!%p2057_p8) target bundleno = 16 (0x10), region = 151 }
 0x2d4   : > { %s2192_s26 = smov %s2184_s29 }
 0x2d6   : > { %s2194_s29 = smov %s2186_s8 }
 0x2d7   : > { %s2195_s30 = smov %s2187_s12 }
 0x2d8   :  { %1025 = vsyncpa [#allocation4], 1 }
 0x2d9   :  { %1027 = vsyncpa [#allocation4 + $0x1], 1 }
 0x2da   :  { %1028 = vsyncpa [#allocation7], 1 }
 0x2db   :  { %1030 = vsyncpa [#allocation7 + $0x1], 1 }
 0x2dc   :  { %1031 = vsyncpa [#allocation5], 1 }
 0x2dd   :  { %1033 = vsyncpa [#allocation5 + $0x1], 1 }

</bundles_post_ra>
